<compile_context>
chip_gen: v7x
topology: tpu7x:2x2x1
jax: 0.10.0
libtpu: 0.0.40
codegen_flags: <defaults>
</compile_context>

<pallas_src>
import numpy as np
import jax
import jax.numpy as jnp
from jax.experimental import pallas as pl
from jax.experimental.pallas import tpu as pltpu


def _round_up(x, m):
    return (x + m - 1) // m * m


def _embedding_sum_kernel(idx_ref, table_ref, bias_ref, out_ref, acc_ref):
    # idx_ref:   (F, TB, 1)   int32   (offsets already applied, clamped)
    # table_ref: (TV, D_pad)  bfloat16 (current V-tile of the embedding table)
    # bias_ref:  (1, D_pad)   float32
    # out_ref:   (TB, D_pad)  float32
    # acc_ref:   (TB, D_pad)  float32 scratch accumulator
    F, TB, _ = idx_ref.shape
    TV = table_ref.shape[0]
    k = pl.program_id(1)

    @pl.when(k == 0)
    def _():
        # Init accumulator with the (broadcast) bias -> no extra add at the end.
        acc_ref[...] = jnp.broadcast_to(bias_ref[...], acc_ref.shape)

    # Multi-hot counts for the current V window:
    #   counts[b, v_local] = #{ f : idx[b, f] == k*TV + v_local }
    v0 = k * TV
    iota_v = jax.lax.broadcasted_iota(jnp.int32, (TB, TV), 1)
    counts = jnp.zeros((TB, TV), jnp.float32)
    for f in range(F):                       # F is small & static -> unrolled
        col = idx_ref[f] - v0                # (TB, 1), sublane-oriented
        counts = counts + (col == iota_v).astype(jnp.float32)

    # Single cast after the loop; counts <= F so bf16 is exact.
    counts_bf16 = counts.astype(jnp.bfloat16)

    # gather + field-sum over this V-tile == counts @ table_tile
    # (MXU, bf16 in, f32 accumulate)
    acc_ref[...] += jnp.dot(counts_bf16, table_ref[...],
                            preferred_element_type=jnp.float32)

    @pl.when(k == pl.num_programs(1) - 1)
    def _():
        out_ref[...] = acc_ref[...]


def feature_embedding_sum(data, table, bias, offsets):
    """data: (B, F) int raw field indices; table: (V, D); returns (B, D) float32."""
    B, F = data.shape
    V, D = table.shape

    # Index arithmetic (same as torch `data + offset`); clamp as an OOB guard
    # (PyTorch would raise on an out-of-range index; Pallas has no bounds check).
    idx = data.astype(jnp.int32) + offsets[None, :].astype(jnp.int32)
    idx = jnp.clip(idx, 0, V - 1)

    # Tile sizes.  Budget (counts vregs/temps + 2*TV*D_pad*2 table bufs +
    # TB*D_pad*4 acc + 2*TB*D_pad*4 out bufs) stays well under the 32 MiB
    # scoped VMEM of v7x for TB<=128, TV<=512, D_pad=128*ceil(D/128).
    TB = min(128, _round_up(B, 8))
    B_pad = _round_up(B, TB)
    D_pad = _round_up(D, 128)               # lane-dense output / table columns
    TV = min(512, _round_up(V, 128))
    V_pad = _round_up(V, TV)

    # Wrapper-side layout plumbing (padding + transposes), no extra kernel compute.
    idx3 = jnp.zeros((F, B_pad, 1), jnp.int32).at[:, :B, 0].set(idx.T)
    table_p = (jnp.zeros((V_pad, D_pad), jnp.bfloat16)
               .at[:V, :D].set(table.astype(jnp.bfloat16)))
    bias_p = jnp.zeros((1, D_pad), jnp.float32).at[0, :D].set(bias.astype(jnp.float32))

    grid = (B_pad // TB, V_pad // TV)       # (B parallel, V reduction last)

    out = pl.pallas_call(
        _embedding_sum_kernel,
        out_shape=jax.ShapeDtypeStruct((B_pad, D_pad), jnp.float32),
        grid_spec=pltpu.PrefetchScalarGridSpec(
            num_scalar_prefetch=0,
            grid=grid,
            in_specs=[
                pl.BlockSpec((F, TB, 1), lambda i, k: (0, i, 0)),    # indices
                pl.BlockSpec((TV, D_pad), lambda i, k: (k, 0)),      # table tile
                pl.BlockSpec((1, D_pad), lambda i, k: (0, 0)),       # bias
            ],
            out_specs=pl.BlockSpec((TB, D_pad), lambda i, k: (i, 0)),
            scratch_shapes=[pltpu.VMEM((TB, D_pad), jnp.float32)],
        ),
        compiler_params=pltpu.CompilerParams(
            dimension_semantics=("parallel", "arbitrary"),
            vmem_limit_bytes=32 * 1024 * 1024,
        ),
    )(idx3, table_p, bias_p)

    return out[:B, :D]


def reference(data, table, bias, offsets):
    idx = data.astype(jnp.int32) + offsets[None, :].astype(jnp.int32)
    emb = table[idx]                      # (B, F, D)
    return jnp.sum(emb, axis=1) + bias[None, :]


if __name__ == "__main__":
    key = jax.random.PRNGKey(0)

    # module config (small, consistent with the PyTorch __init__)
    feature_dims = [3, 5, 8]              # per-field vocab sizes
    out_dim = 4
    V = int(sum(feature_dims))            # total embedding rows
    B, F = 8, len(feature_dims)

    # offsets = [0, cumsum(feature_dims)[:-1]]
    offsets = jnp.asarray(
        np.array([0, *np.cumsum(feature_dims)[:-1]], dtype=np.int32))

    # deterministic parameters (synthetic init; no checkpoint load)
    k_w, k_d = jax.random.split(key)
    table = jax.random.normal(k_w, (V, out_dim), dtype=jnp.float32)
    bias = jnp.zeros((out_dim,), dtype=jnp.float32)

    # deterministic input: per-field index in [0, feature_dims[f])
    data = jnp.stack(
        [jax.random.randint(jax.random.fold_in(k_d, f), (B,), 0, feature_dims[f])
         for f in range(F)], axis=1).astype(jnp.int32)

    out = feature_embedding_sum(data, table, bias, offsets)
    out = jax.block_until_ready(out)

    ref = reference(data, table, bias, offsets)
    assert out.shape == (B, out_dim), out.shape
    # Tolerance accounts for the bf16 cast of the embedding table (MXU-native path);
    # counts are exact in bf16 so the only quantization is on table values.
    np.testing.assert_allclose(np.asarray(out), np.asarray(ref),
                               rtol=2e-2, atol=2e-2)
    print("KERNEL_OK")
</pallas_src>

<mosaic_0001>
module attributes {stable_mosaic.version = 11 : i64} {
  func.func @_embedding_sum_kernel(%arg0: i32, %arg1: i32, %arg2: memref<3x8x1xi32, #tpu.memory_space<vmem>>, %arg3: memref<128x128xbf16, #tpu.memory_space<vmem>>, %arg4: memref<1x128xf32, #tpu.memory_space<vmem>>, %arg5: memref<8x128xf32, #tpu.memory_space<vmem>>, %arg6: memref<8x128xf32, #tpu.memory_space<vmem>>) attributes {dimension_semantics = [#tpu.dimension_semantics<parallel>, #tpu.dimension_semantics<arbitrary>], iteration_bounds = array<i64: 1, 1>, scalar_prefetch = 0 : i64, scratch_operands = 1 : i64, tpu.core_type = #tpu.core_type<tc>, window_params = [{transform_indices = @transform_0, window_bounds = array<i64: 3, 8, 1>}, {transform_indices = @transform_1, window_bounds = array<i64: 128, 128>}, {pipeline_mode = #tpu.pipeline_mode<synchronous>, transform_indices = @transform_2, window_bounds = array<i64: 1, 128>}, {transform_indices = @transform_3, window_bounds = array<i64: 8, 128>}]} {
    %c0_i32 = arith.constant 0 : i32
    %0 = arith.cmpi eq, %arg1, %c0_i32 : i32
    %1 = arith.extui %0 : i1 to i32
    %c0_i32_0 = arith.constant 0 : i32
    %2 = arith.cmpi ne, %1, %c0_i32_0 : i32
    scf.if %2 {
      %c0_16 = arith.constant 0 : index
      %c0_17 = arith.constant 0 : index
      %42 = vector.load %arg4[%c0_16, %c0_17] : memref<1x128xf32, #tpu.memory_space<vmem>>, vector<1x128xf32>
      %43 = vector.shape_cast %42 : vector<1x128xf32> to vector<1x128xf32>
      %44 = vector.broadcast %43 : vector<1x128xf32> to vector<8x128xf32>
      %c0_18 = arith.constant 0 : index
      %c0_19 = arith.constant 0 : index
      %45 = vector.load %arg6[%c0_18, %c0_19] : memref<8x128xf32, #tpu.memory_space<vmem>>, vector<8x128xf32>
      tpu.vector_store %arg6[%c0_18, %c0_19], %44 {strides = array<i32>} : memref<8x128xf32, #tpu.memory_space<vmem>>, vector<8x128xf32>,
    } else {
    }
    %c128_i32 = arith.constant 128 : i32
    %3 = arith.muli %arg1, %c128_i32 : i32
    %4 = tpu.iota {dimensions = array<i32: 1>} : vector<8x128xi32>
    %cst = arith.constant 0.000000e+00 : f32
    %5 = vector.broadcast %cst : f32 to vector<8x128xf32>
    %c0 = arith.constant 0 : index
    %c0_1 = arith.constant 0 : index
    %c0_2 = arith.constant 0 : index
    %6 = vector.load %arg2[%c0, %c0_1, %c0_2] : memref<3x8x1xi32, #tpu.memory_space<vmem>>, vector<1x8x1xi32>
    %7 = vector.shape_cast %6 : vector<1x8x1xi32> to vector<8x1xi32>
    %8 = vector.broadcast %3 : i32 to vector<8x1xi32>
    %9 = arith.subi %7, %8 : vector<8x1xi32>
    %10 = vector.broadcast %9 : vector<8x1xi32> to vector<8x128xi32>
    %11 = arith.cmpi eq, %10, %4 : vector<8x128xi32>
    %12 = arith.extui %11 : vector<8x128xi1> to vector<8x128xi32>
    %13 = arith.sitofp %12 : vector<8x128xi32> to vector<8x128xf32>
    %14 = arith.addf %5, %13 : vector<8x128xf32>
    %c1 = arith.constant 1 : index
    %c0_3 = arith.constant 0 : index
    %c0_4 = arith.constant 0 : index
    %15 = vector.load %arg2[%c1, %c0_3, %c0_4] : memref<3x8x1xi32, #tpu.memory_space<vmem>>, vector<1x8x1xi32>
    %16 = vector.shape_cast %15 : vector<1x8x1xi32> to vector<8x1xi32>
    %17 = vector.broadcast %3 : i32 to vector<8x1xi32>
    %18 = arith.subi %16, %17 : vector<8x1xi32>
    %19 = vector.broadcast %18 : vector<8x1xi32> to vector<8x128xi32>
    %20 = arith.cmpi eq, %19, %4 : vector<8x128xi32>
    %21 = arith.extui %20 : vector<8x128xi1> to vector<8x128xi32>
    %22 = arith.sitofp %21 : vector<8x128xi32> to vector<8x128xf32>
    %23 = arith.addf %14, %22 : vector<8x128xf32>
    %c2 = arith.constant 2 : index
    %c0_5 = arith.constant 0 : index
    %c0_6 = arith.constant 0 : index
    %24 = vector.load %arg2[%c2, %c0_5, %c0_6] : memref<3x8x1xi32, #tpu.memory_space<vmem>>, vector<1x8x1xi32>
    %25 = vector.shape_cast %24 : vector<1x8x1xi32> to vector<8x1xi32>
    %26 = vector.broadcast %3 : i32 to vector<8x1xi32>
    %27 = arith.subi %25, %26 : vector<8x1xi32>
    %28 = vector.broadcast %27 : vector<8x1xi32> to vector<8x128xi32>
    %29 = arith.cmpi eq, %28, %4 : vector<8x128xi32>
    %30 = arith.extui %29 : vector<8x128xi1> to vector<8x128xi32>
    %31 = arith.sitofp %30 : vector<8x128xi32> to vector<8x128xf32>
    %32 = arith.addf %23, %31 : vector<8x128xf32>
    %33 = arith.truncf %32 : vector<8x128xf32> to vector<8x128xbf16>
    %c0_7 = arith.constant 0 : index
    %c0_8 = arith.constant 0 : index
    %34 = vector.load %arg6[%c0_7, %c0_8] : memref<8x128xf32, #tpu.memory_space<vmem>>, vector<8x128xf32>
    %c0_9 = arith.constant 0 : index
    %c0_10 = arith.constant 0 : index
    %35 = vector.load %arg3[%c0_9, %c0_10] : memref<128x128xbf16, #tpu.memory_space<vmem>>, vector<128x128xbf16>
    %cst_11 = arith.constant dense<0.000000e+00> : vector<8x128xf32>
    %36 = tpu.matmul %33, %35, %cst_11 {dimension_numbers = #tpu.dot_dimension_numbers<[1], [0], [0], [1], [0, 0, 1, 1], [], []>} : vector<8x128xbf16>, vector<128x128xbf16>, vector<8x128xf32> -> vector<8x128xf32>
    %37 = arith.addf %34, %36 : vector<8x128xf32>
    %c0_12 = arith.constant 0 : index
    %c0_13 = arith.constant 0 : index
    %38 = vector.load %arg6[%c0_12, %c0_13] : memref<8x128xf32, #tpu.memory_space<vmem>>, vector<8x128xf32>
    tpu.vector_store %arg6[%c0_12, %c0_13], %37 {strides = array<i32>} : memref<8x128xf32, #tpu.memory_space<vmem>>, vector<8x128xf32>,
    %c0_i32_14 = arith.constant 0 : i32
    %39 = arith.cmpi eq, %arg1, %c0_i32_14 : i32
    %40 = arith.extui %39 : i1 to i32
    %c0_i32_15 = arith.constant 0 : i32
    %41 = arith.cmpi ne, %40, %c0_i32_15 : i32
    scf.if %41 {
      %c0_16 = arith.constant 0 : index
      %c0_17 = arith.constant 0 : index
      %42 = vector.load %arg6[%c0_16, %c0_17] : memref<8x128xf32, #tpu.memory_space<vmem>>, vector<8x128xf32>
      %c0_18 = arith.constant 0 : index
      %c0_19 = arith.constant 0 : index
      %43 = vector.load %arg5[%c0_18, %c0_19] : memref<8x128xf32, #tpu.memory_space<vmem>>, vector<8x128xf32>
      tpu.vector_store %arg5[%c0_18, %c0_19], %42 {strides = array<i32>} : memref<8x128xf32, #tpu.memory_space<vmem>>, vector<8x128xf32>,
    } else {
    }
    return
  }
  func.func @transform_0(%arg0: i32, %arg1: i32) -> (i32, i32, i32) {
    %c0_i32 = arith.constant 0 : i32
    %c0_i32_0 = arith.constant 0 : i32
    %c0_i32_1 = arith.constant 0 : i32
    return %c0_i32, %arg0, %c0_i32_0 : i32, i32, i32
  }
  func.func @transform_1(%arg0: i32, %arg1: i32) -> (i32, i32) {
    %c0_i32 = arith.constant 0 : i32
    %c0_i32_0 = arith.constant 0 : i32
    return %arg1, %c0_i32 : i32, i32
  }
  func.func @transform_2(%arg0: i32, %arg1: i32) -> (i32, i32) {
    %c0_i32 = arith.constant 0 : i32
    %c0_i32_0 = arith.constant 0 : i32
    %c0_i32_1 = arith.constant 0 : i32
    return %c0_i32, %c0_i32_0 : i32, i32
  }
  func.func @transform_3(%arg0: i32, %arg1: i32) -> (i32, i32) {
    %c0_i32 = arith.constant 0 : i32
    %c0_i32_0 = arith.constant 0 : i32
    return %arg0, %c0_i32 : i32, i32
  }
}

</mosaic_0001>

<bundles_post_ra>
// kernel: tpu_custom_call.1
= control target key start
LH: loop header
LB: loop body
LE: loop exit
PB: predicated region body
PF: predicated region fallthrough
CT: control target
= control target key end

     0   :  { %8 = vsyncpa [#allocation4], 0  ;;  %s374_s0 = inlined_call_operand.vmem [shape: s32[3,8,1], index: 0, kind: input, shape index: {}]   ;;  %s375_s1 = inlined_call_operand.hbm [shape: bf16[128,128], index: 1, kind: input, shape index: {}]   ;;  %s376_s2 = inlined_call_operand.vmem [shape: f32[1,128], index: 2, kind: input, shape index: {}]   ;;  %s377_s3 = inlined_call_operand.hbm [shape: f32[8,128], index: 3, kind: output, shape index: {}]  }
   0x1   :  { %9 = vsyncpa [#allocation5], 0  ;;  %s311_s12 = smov [#allocation3]   ;;  %s263_s16 = scalar_lea.hbm %s375_s1, 1024 }
   0x2   :  { %s17_s13 = sshll.u32 %s311_s12, 4  ;;  %p264_p0 = scmp.ne.s32.totalorder %s375_s1, %s263_s16  ;;  %s18_s13 = int_to_ptr.vmem [resolvable:$true] %s17_s13 }
   0x3   :  { %p267_p1 = scmp.lt.u32.totalorder %s263_s16, %s375_s1 }
   0x5   :  { %p269_p2 = pnand %p267_p1, %p264_p0 }
   0x7   :  { %272 = shalt.err (!%p269_p2)
}
   0x8   :  { %s273_s21 = scalar_lea.vmem %s18_s13, 1024  ;;  %p278_p4 = scmp.lt.s32.totalorder %s18_s13, %s18_s13 }
   0x9   :  { %p274_p3 = scmp.ne.s32.totalorder %s18_s13, %s273_s21  ;;  %p279_p5 = scmp.lt.s32.totalorder %s273_s21, %s273_s21 }
   0xb   :  { %p280_p6 = por %p279_p5, %p278_p4 }
   0xd   :  { %p281_p7 = pnand %p280_p6, %p274_p3 }
   0xf   :  { %284 = shalt.err (!%p281_p7)
}
  0x10   :  { %s312_s22 = smov 64   ;;  %s313_s23 = smov 4  }
  0x11   :  { %23 = dma.hbm_to_vmem [thread:$0]  %s375_s1, 1024, %s18_s13, [#allocation4], %s312_s22, %s312_s22, %s313_s23  }
  0x12   :  { %307 = dma.done.wait [#allocation4], 1024  }
  0x13   :  { %308 = vsyncadd [#allocation4], 4294966272  ;;  %v314_v0 = vmov 0   ;;  %v315_v1 = vmov 0.0   ;;  %v45_v2 = vld [vmem:[%s374_s0] sm:$0xff]  ;;  %v207_v3 = vld [vmem:[%s374_s0 + $0x10] sm:$0xff]  ;;  %v43_v13 = vlaneseq }
  0x14   :  { %253 = vset.pattern.permute.xlu0 %v314_v0  ;;  %254 = vset.pattern.permute.xlu1 %v314_v0  ;;  %v255_v4 = vld [vmem:[#allocation3] sm:$0xff]   ;;  %v205_v5 = vld [vmem:[%s374_s0 + $0x8] sm:$0xff]  ;;  %v256_v6 = vld [vmem:[#allocation3 + $0x8] sm:$0xff]   ;;  %vm316_vm0 = vmmov 0   ;;  %s317_s5 = smov [#allocation6]  }
  0x15   :  { %226 = vmatprep.subr.bf16.mxu0 %v315_v1  ;;  %49 = vperm.xlu0 %253, %v45_v2   ;;  %v257_v7 = vld [vmem:[#allocation3 + $0x10] sm:$0xff]   ;;  %v258_v8 = vld [vmem:[#allocation3 + $0x18] sm:$0xff]   ;;  %v259_v9 = vld [vmem:[#allocation3 + $0x20] sm:$0xff]   ;;  %v44_v14 = vand.u32 127, %v43_v13  ;;  %s194_s6 = sshll.u32 %s317_s5, 4  ;;  %s195_s6 = int_to_ptr.vmem [resolvable:$true] %s194_s6 }
  0x16   :  { %69 = vperm.xlu1 %254, %v207_v3   ;;  %227 = vmatpush3.bf16.msra.mxu0 %v255_v4  ;;  %v260_v10 = vld [vmem:[#allocation3 + $0x28] sm:$0xff]   ;;  %v261_v11 = vld [vmem:[#allocation3 + $0x30] sm:$0xff]   ;;  %v262_v12 = vld [vmem:[#allocation3 + $0x38] sm:$0xff]   ;;  %s285_s7 = scalar_lea.vmem %s195_s6, 128  ;;  %p290_p9 = scmp.lt.s32.totalorder %s195_s6, %s195_s6 }
  0x17   :  { %228 = vmatprep.subr.bf16.mxu0 %v315_v1  ;;  %242 = vmatprep.mubr.msk.bf16.mxu0 %vm316_vm0, %v315_v1  ;;  %v203_v24 = vld [vmem:[%s376_s2] ss:$0 sm:$0xff]  ;;  %p286_p8 = scmp.ne.s32.totalorder %s195_s6, %s285_s7  ;;  %p291_p10 = scmp.lt.s32.totalorder %s285_s7, %s285_s7 }
  0x19   :  { %59 = vperm.xlu0 %253, %v205_v5   ;;  %p292_p11 = por %p291_p10, %p290_p9 }
  0x1a   :  { %229 = vmatpush3.bf16.msra.mxu0 %v256_v6 }
  0x1b   :  { %230 = vmatprep.subr.bf16.mxu0 %v315_v1  ;;  %p293_p12 = pnand %p292_p11, %p286_p8 }
  0x1e   :  { %231 = vmatpush3.bf16.msra.mxu0 %v257_v7 }
  0x1f   :  { %232 = vmatprep.subr.bf16.mxu0 %v315_v1 }
  0x22   :  { %233 = vmatpush3.bf16.msra.mxu0 %v258_v8 }
  0x23   :  { %234 = vmatprep.subr.bf16.mxu0 %v315_v1 }
  0x26   :  { %235 = vmatpush3.bf16.msra.mxu0 %v259_v9 }
  0x27   :  { %236 = vmatprep.subr.bf16.mxu0 %v315_v1 }
  0x2a   :  { %237 = vmatpush3.bf16.msra.mxu0 %v260_v10 }
  0x2b   :  { %238 = vmatprep.subr.bf16.mxu0 %v315_v1 }
  0x2e   :  { %239 = vmatpush3.bf16.msra.mxu0 %v261_v11 }
  0x2f   :  { %240 = vmatprep.subr.bf16.mxu0 %v315_v1 }
  0x32   :  { %241 = vmatpush3.bf16.msra.mxu0 %v262_v12 }
  0x94   :  { %v50_v15 = vpop.permute.xlu0 %49 }
  0x95   :  { %v70_v16 = vpop.permute.xlu1 %69  ;;  %vm51_vm1 = vcmp.eq.s32.totalorder %v50_v15, %v44_v14 }
  0x96   :  { %vm71_vm2 = vcmp.eq.s32.totalorder %v70_v16, %v44_v14  ;;  %v204_v18 = vsel %vm51_vm1, 1.0, %v315_v1 }
  0x97   :  { %v208_v20 = vsel %vm71_vm2, 1.0, %v315_v1 }
  0x98   :  { %v60_v17 = vpop.permute.xlu0 %59 }
  0x99   :  { %vm61_vm3 = vcmp.eq.s32.totalorder %v60_v17, %v44_v14 }
  0x9a   :  { %v206_v19 = vsel %vm61_vm3, 1.0, %v315_v1 }
  0x9b   :  { %v64_v21 = vadd.f32 %v206_v19, %v204_v18 }
  0x9d   :  { %v74_v22 = vadd.f32 %v208_v20, %v64_v21 }
  0x9f   :  { %v75_v23 = vpack.c.bf16 %v74_v22, %v74_v22 }
  0xa1   :  { %243 = vmatmul.mubr.bf16.vlgmr.msra.gmra.mrb[0].mxu0 %v75_v23 }
 0x174   :  { %v175_v25 = vpop.f32.mrb[0].mxu0 }
 0x175   :  { %v181_v26 = vadd.f32 %v203_v24, %v175_v25  ;;  %v244_v27 = vpop.f32.mrb[1].mxu0 }
 0x176   :  { %v178_v28 = vpop.f32.mrb[2].mxu0 }
 0x177   :  { %187 = vst [vmem:[#allocation6] sm:$0xff] %v181_v26  ;;  %v245_v29 = vpop.f32.mrb[3].mxu0 }
 0x178   :  { %296 = shalt.err (!%p293_p12)
}
 0x179   :  { %s297_s2 = scalar_lea.hbm %s377_s3, 128 }
 0x17a   :  { %p298_p13 = scmp.ne.s32.totalorder %s377_s3, %s297_s2  ;;  %p301_p0 = scmp.lt.u32.totalorder %s297_s2, %s377_s3 }
 0x17c   :  { %p303_p1 = pnand %p301_p0, %p298_p13 }
 0x17e   :  { %306 = shalt.err (!%p303_p1)
}
 0x17f   :  { %197 = dma.vmem_to_hbm [thread:$0]  %s195_s6, 128, %s377_s3, [#allocation5]  }
 0x180   :  { %309 = dma.done.wait [#allocation5], 128  }
 0x181   :  { %310 = vsyncadd [#allocation5], 4294967168 }
 0x182   :  { %201 = vsyncpa [#allocation4], 1 }
 0x183   :  { %202 = vsyncpa [#allocation5], 1 }

</bundles_post_ra>
